<compile_context>
chip_gen: v5e
topology: v5e:2x2
jax: 0.10.0
libtpu: 0.0.40
codegen_flags: <defaults>
</compile_context>

<pallas_src>
import jax
import jax.numpy as jnp
from jax.experimental import pallas as pl
from jax.experimental.pallas import tpu as pltpu


COMPUTE_DTYPE = jnp.bfloat16   # MXU-native; accumulation / epilogue stay f32.


# -----------------------------------------------------------------------------
# Fused kernel: 3x3 conv (BN folded) + LeakyReLU(0.1) + 1x1 conv + bias + ReLU.
# One batch element per grid step; all operands lane-dense.
# -----------------------------------------------------------------------------
def lightnet_fused_kernel(x_ref, a_ref, w2_ref, bias_ref, o_ref):
    # x_ref:    (1, H+2, W*Cin)     bf16, zero halo row at top and bottom
    # a_ref:    (3, W*Cin, W*Cmid)  bf16, banded conv1 weights (kw + BN scale folded in)
    # w2_ref:   (W*Cmid, W*Cout)    bf16, block-diagonal 1x1 conv weight
    # bias_ref: (2, W*Cout)         f32, row 0 = BN bias (tiled W), row 1 = conv2 bias
    # o_ref:    (1, H, W*Cout)      f32, lane-dense output slab
    H = o_ref.shape[1]
    x = x_ref[0]                                    # (H+2, W*Cin)
    bias = bias_ref[...]                            # (2, W*Cout)

    # kh handled by row offsets on the padded strip; kw is folded into the
    # banded weight blocks -> three MXU matmuls, f32 accumulation.
    h1 = (jnp.dot(x[0:H],     a_ref[0], preferred_element_type=jnp.float32)
          + jnp.dot(x[1:H + 1], a_ref[1], preferred_element_type=jnp.float32)
          + jnp.dot(x[2:H + 2], a_ref[2], preferred_element_type=jnp.float32)
          + bias[0:1])                              # (H, W*Cmid) f32, BN bias added
    h1 = jnp.where(h1 > 0, h1, 0.1 * h1)            # LeakyReLU(0.1), f32 epilogue

    h2 = jnp.dot(h1.astype(w2_ref.dtype), w2_ref[...],
                 preferred_element_type=jnp.float32) + bias[1:2]
    o_ref[0] = jnp.maximum(h2, 0.0)                 # ReLU, f32 store


# -----------------------------------------------------------------------------
# One-time weight preparation (hoisted out of the per-call forward).
# -----------------------------------------------------------------------------
def prepare_lightnet_params(params, W, compute_dtype=COMPUTE_DTYPE):
    w1 = params["w1"]                               # (3, 3, Cin, Cmid), HWIO
    Cin, Cmid = w1.shape[2], w1.shape[3]
    Cout = params["b2"].shape[0]
    assert Cmid == Cout, "merged bias operand assumes Cmid == Cout"

    # Fold the BatchNorm scale into the conv1 weights.
    w1 = w1 * params["bn_scale"].reshape(1, 1, 1, Cmid)

    # Banded conv1 weights, one (W*Cin, W*Cmid) matrix per kh tap:
    # output w-block w receives input w-blocks w-1, w, w+1 (the kw taps);
    # missing border blocks encode the zero padding in w.
    a = jnp.stack([
        sum(jnp.kron(jnp.eye(W, k=1 - kw, dtype=w1.dtype), w1[kh, kw])
            for kw in range(3))
        for kh in range(3)
    ]).astype(compute_dtype)                        # (3, W*Cin, W*Cmid)

    # Block-diagonal 1x1 conv weight -> lane-dense (.., W*Cout = 128) output.
    w2_blk = jnp.kron(jnp.eye(W, dtype=params["w2"].dtype),
                      params["w2"]).astype(compute_dtype)   # (W*Cmid, W*Cout)

    # Merge both bias vectors into one f32 operand.
    bias = jnp.stack([jnp.tile(params["bn_bias"], W),
                      jnp.tile(params["b2"], W)]).astype(jnp.float32)  # (2, W*Cout)

    return {"a": a, "w2": w2_blk, "bias": bias}


# -----------------------------------------------------------------------------
# Forward: NHWC end-to-end (no layout round trips in the hot path).
# -----------------------------------------------------------------------------
@jax.jit
def lightnet_forward(x_nhwc, prep):
    """Lightnet.forward: sequential layer stack, fused into one Pallas kernel."""
    N, H, W, Cin = x_nhwc.shape
    Cout = prep["bias"].shape[1] // W

    # Lane-dense activation rows (W*Cin on lanes) + one zero halo row top and
    # bottom; the pad fuses with the bf16 cast into a single cheap XLA op.
    x = x_nhwc.astype(COMPUTE_DTYPE).reshape(N, H, W * Cin)
    x = jnp.pad(x, ((0, 0), (1, 1), (0, 0)))        # (N, H+2, W*Cin)

    out = pl.pallas_call(
        lightnet_fused_kernel,
        out_shape=jax.ShapeDtypeStruct((N, H, W * Cout), jnp.float32),
        grid_spec=pltpu.PrefetchScalarGridSpec(
            num_scalar_prefetch=0,
            grid=(N,),
            in_specs=[
                pl.BlockSpec((1, H + 2, W * Cin), lambda n: (n, 0, 0)),
                # Constant index_maps: weight/bias DMAs are issued only once.
                pl.BlockSpec(prep["a"].shape, lambda n: (0, 0, 0)),
                pl.BlockSpec(prep["w2"].shape, lambda n: (0, 0)),
                pl.BlockSpec(prep["bias"].shape, lambda n: (0, 0)),
            ],
            out_specs=pl.BlockSpec((1, H, W * Cout), lambda n: (n, 0, 0)),
        ),
        compiler_params=pltpu.CompilerParams(
            dimension_semantics=("parallel",),      # shard batch on v7x's 2 TCs
        ),
    )(x, prep["a"], prep["w2"], prep["bias"])

    # (N, H, W*Cout) -> (N, H, W, Cout) is a free row-major reshape.
    return out.reshape(N, H, W, Cout)


# -----------------------------------------------------------------------------
# Parameters + pure-JAX reference (NCHW, mirrors the PyTorch Sequential).
# -----------------------------------------------------------------------------
def make_lightnet_params(key, cin=4, cmid=8, cout=8):
    k1, k2, k3 = jax.random.split(key, 3)
    # Conv2d(cin, cmid, 3, padding=1, bias=False): torch weight (cmid, cin, 3, 3)
    w1_oihw = jax.random.normal(k1, (cmid, cin, 3, 3), jnp.float32) * 0.1
    # BatchNorm2d(cmid) in eval mode (deterministic running stats + affine).
    gamma = 1.0 + 0.1 * jnp.arange(cmid, dtype=jnp.float32)
    beta = 0.01 * jnp.arange(cmid, dtype=jnp.float32)
    run_mean = 0.05 * jnp.arange(cmid, dtype=jnp.float32)
    run_var = 1.0 + 0.02 * jnp.arange(cmid, dtype=jnp.float32)
    eps = 1e-5
    # Conv2d(cmid, cout, 1, bias=True): weight (cout, cmid, 1, 1), bias (cout,)
    w2_oihw = jax.random.normal(k2, (cout, cmid, 1, 1), jnp.float32) * 0.1
    b2 = jax.random.normal(k3, (cout,), jnp.float32) * 0.1

    scale = gamma / jnp.sqrt(run_var + eps)          # BN folded to affine
    bias = beta - run_mean * scale
    w1_hwio = jnp.transpose(w1_oihw, (2, 3, 1, 0))   # (3, 3, Cin, Cmid)
    w2_io = jnp.transpose(w2_oihw[:, :, 0, 0], (1, 0))   # (Cmid, Cout)
    return {
        "w1": w1_hwio,
        "bn_scale": scale,
        "bn_bias": bias,
        "w2": w2_io,
        "b2": b2,
        "w1_oihw": w1_oihw,
        "w2_oihw": w2_oihw,
    }


def reference_forward(x_nchw, params):
    dn = jax.lax.conv_dimension_numbers(x_nchw.shape, params["w1_oihw"].shape,
                                        ("NCHW", "OIHW", "NCHW"))
    y = jax.lax.conv_general_dilated(x_nchw, params["w1_oihw"], (1, 1),
                                     ((1, 1), (1, 1)), dimension_numbers=dn)
    y = y * params["bn_scale"].reshape(1, -1, 1, 1) + params["bn_bias"].reshape(1, -1, 1, 1)
    y = jnp.where(y > 0, y, 0.1 * y)
    dn2 = jax.lax.conv_dimension_numbers(y.shape, params["w2_oihw"].shape,
                                         ("NCHW", "OIHW", "NCHW"))
    z = jax.lax.conv_general_dilated(y, params["w2_oihw"], (1, 1),
                                     ((0, 0), (0, 0)), dimension_numbers=dn2)
    z = z + params["b2"].reshape(1, -1, 1, 1)
    return jnp.maximum(z, 0.0)


if __name__ == "__main__":
    key = jax.random.PRNGKey(0)
    kx, kp = jax.random.split(key)
    # PyTorch-style NCHW example input; converted to NHWC once as data prep
    # (outside the steady-state forward path).
    x_nchw = jax.random.normal(kx, (2, 4, 16, 16), jnp.float32)
    params = make_lightnet_params(kp)

    prep = prepare_lightnet_params(params, W=16)     # one-time weight packing
    x_nhwc = jnp.transpose(x_nchw, (0, 2, 3, 1))

    out_nhwc = lightnet_forward(x_nhwc, prep)
    out_nhwc = jax.block_until_ready(out_nhwc)

    ref_nhwc = jnp.transpose(reference_forward(x_nchw, params), (0, 2, 3, 1))
    assert out_nhwc.shape == (2, 16, 16, 8)
    max_err = float(jnp.max(jnp.abs(out_nhwc - ref_nhwc)))
    # bf16 inputs/weights with f32 accumulation -> loosened (but tight) tolerance.
    assert jnp.allclose(out_nhwc, ref_nhwc, atol=3e-2, rtol=3e-2), max_err
    print("KERNEL_OK")
</pallas_src>

<mosaic_0001>
module attributes {stable_mosaic.version = 11 : i64} {
  func.func @lightnet_fused_kernel(%arg0: i32, %arg1: memref<1x18x64xbf16, #tpu.memory_space<vmem>>, %arg2: memref<3x64x128xbf16, #tpu.memory_space<vmem>>, %arg3: memref<128x128xbf16, #tpu.memory_space<vmem>>, %arg4: memref<2x128xf32, #tpu.memory_space<vmem>>, %arg5: memref<1x16x128xf32, #tpu.memory_space<vmem>>) attributes {dimension_semantics = [#tpu.dimension_semantics<parallel>], iteration_bounds = array<i64: 2>, scalar_prefetch = 0 : i64, scratch_operands = 0 : i64, tpu.core_type = #tpu.core_type<tc>, window_params = [{transform_indices = @transform_0, window_bounds = array<i64: 1, 18, 64>}, {pipeline_mode = #tpu.pipeline_mode<synchronous>, transform_indices = @transform_1, window_bounds = array<i64: 3, 64, 128>}, {pipeline_mode = #tpu.pipeline_mode<synchronous>, transform_indices = @transform_2, window_bounds = array<i64: 128, 128>}, {pipeline_mode = #tpu.pipeline_mode<synchronous>, transform_indices = @transform_3, window_bounds = array<i64: 2, 128>}, {transform_indices = @transform_4, window_bounds = array<i64: 1, 16, 128>}]} {
    %c0 = arith.constant 0 : index
    %c0_0 = arith.constant 0 : index
    %c0_1 = arith.constant 0 : index
    %0 = vector.load %arg1[%c0, %c0_0, %c0_1] : memref<1x18x64xbf16, #tpu.memory_space<vmem>>, vector<1x18x64xbf16>
    %1 = vector.shape_cast %0 : vector<1x18x64xbf16> to vector<18x64xbf16>
    %c0_2 = arith.constant 0 : index
    %c0_3 = arith.constant 0 : index
    %2 = vector.load %arg4[%c0_2, %c0_3] : memref<2x128xf32, #tpu.memory_space<vmem>>, vector<2x128xf32>
    %3 = vector.extract_strided_slice %1 {offsets = [0, 0], sizes = [16, 64], strides = [1, 1]} : vector<18x64xbf16> to vector<16x64xbf16>
    %c0_4 = arith.constant 0 : index
    %c0_5 = arith.constant 0 : index
    %c0_6 = arith.constant 0 : index
    %4 = vector.load %arg2[%c0_4, %c0_5, %c0_6] : memref<3x64x128xbf16, #tpu.memory_space<vmem>>, vector<1x64x128xbf16>
    %5 = vector.shape_cast %4 : vector<1x64x128xbf16> to vector<64x128xbf16>
    %cst = arith.constant dense<0.000000e+00> : vector<16x128xf32>
    %6 = tpu.matmul %3, %5, %cst {dimension_numbers = #tpu.dot_dimension_numbers<[1], [0], [0], [1], [0, 0, 1, 1], [], []>} : vector<16x64xbf16>, vector<64x128xbf16>, vector<16x128xf32> -> vector<16x128xf32>
    %7 = vector.extract_strided_slice %1 {offsets = [1, 0], sizes = [16, 64], strides = [1, 1]} : vector<18x64xbf16> to vector<16x64xbf16>
    %c1 = arith.constant 1 : index
    %c0_7 = arith.constant 0 : index
    %c0_8 = arith.constant 0 : index
    %8 = vector.load %arg2[%c1, %c0_7, %c0_8] : memref<3x64x128xbf16, #tpu.memory_space<vmem>>, vector<1x64x128xbf16>
    %9 = vector.shape_cast %8 : vector<1x64x128xbf16> to vector<64x128xbf16>
    %cst_9 = arith.constant dense<0.000000e+00> : vector<16x128xf32>
    %10 = tpu.matmul %7, %9, %cst_9 {dimension_numbers = #tpu.dot_dimension_numbers<[1], [0], [0], [1], [0, 0, 1, 1], [], []>} : vector<16x64xbf16>, vector<64x128xbf16>, vector<16x128xf32> -> vector<16x128xf32>
    %11 = arith.addf %6, %10 : vector<16x128xf32>
    %12 = vector.extract_strided_slice %1 {offsets = [2, 0], sizes = [16, 64], strides = [1, 1]} : vector<18x64xbf16> to vector<16x64xbf16>
    %c2 = arith.constant 2 : index
    %c0_10 = arith.constant 0 : index
    %c0_11 = arith.constant 0 : index
    %13 = vector.load %arg2[%c2, %c0_10, %c0_11] : memref<3x64x128xbf16, #tpu.memory_space<vmem>>, vector<1x64x128xbf16>
    %14 = vector.shape_cast %13 : vector<1x64x128xbf16> to vector<64x128xbf16>
    %cst_12 = arith.constant dense<0.000000e+00> : vector<16x128xf32>
    %15 = tpu.matmul %12, %14, %cst_12 {dimension_numbers = #tpu.dot_dimension_numbers<[1], [0], [0], [1], [0, 0, 1, 1], [], []>} : vector<16x64xbf16>, vector<64x128xbf16>, vector<16x128xf32> -> vector<16x128xf32>
    %16 = arith.addf %11, %15 : vector<16x128xf32>
    %17 = vector.extract_strided_slice %2 {offsets = [0, 0], sizes = [1, 128], strides = [1, 1]} : vector<2x128xf32> to vector<1x128xf32>
    %18 = vector.broadcast %17 : vector<1x128xf32> to vector<16x128xf32>
    %19 = arith.addf %16, %18 : vector<16x128xf32>
    %cst_13 = arith.constant 0.000000e+00 : f32
    %20 = vector.broadcast %cst_13 : f32 to vector<16x128xf32>
    %21 = arith.cmpf ogt, %19, %20 : vector<16x128xf32>
    %cst_14 = arith.constant 1.000000e-01 : f32
    %22 = vector.broadcast %cst_14 : f32 to vector<16x128xf32>
    %23 = arith.mulf %22, %19 : vector<16x128xf32>
    %24 = arith.select %21, %19, %23 : vector<16x128xi1>, vector<16x128xf32>
    %25 = arith.truncf %24 : vector<16x128xf32> to vector<16x128xbf16>
    %c0_15 = arith.constant 0 : index
    %c0_16 = arith.constant 0 : index
    %26 = vector.load %arg3[%c0_15, %c0_16] : memref<128x128xbf16, #tpu.memory_space<vmem>>, vector<128x128xbf16>
    %cst_17 = arith.constant dense<0.000000e+00> : vector<16x128xf32>
    %27 = tpu.matmul %25, %26, %cst_17 {dimension_numbers = #tpu.dot_dimension_numbers<[1], [0], [0], [1], [0, 0, 1, 1], [], []>} : vector<16x128xbf16>, vector<128x128xbf16>, vector<16x128xf32> -> vector<16x128xf32>
    %28 = vector.extract_strided_slice %2 {offsets = [1, 0], sizes = [1, 128], strides = [1, 1]} : vector<2x128xf32> to vector<1x128xf32>
    %29 = vector.broadcast %28 : vector<1x128xf32> to vector<16x128xf32>
    %30 = arith.addf %27, %29 : vector<16x128xf32>
    %cst_18 = arith.constant 0.000000e+00 : f32
    %31 = vector.broadcast %cst_18 : f32 to vector<16x128xf32>
    %32 = arith.maximumf %30, %31 : vector<16x128xf32>
    %c0_19 = arith.constant 0 : index
    %c0_20 = arith.constant 0 : index
    %c0_21 = arith.constant 0 : index
    %33 = vector.load %arg5[%c0_19, %c0_20, %c0_21] : memref<1x16x128xf32, #tpu.memory_space<vmem>>, vector<1x16x128xf32>
    %34 = vector.shape_cast %33 : vector<1x16x128xf32> to vector<16x128xf32>
    %35 = vector.shape_cast %32 : vector<16x128xf32> to vector<1x16x128xf32>
    tpu.vector_store %arg5[%c0_19, %c0_20, %c0_21], %35 {strides = array<i32>} : memref<1x16x128xf32, #tpu.memory_space<vmem>>, vector<1x16x128xf32>,
    return
  }
  func.func @transform_0(%arg0: i32) -> (i32, i32, i32) {
    %c0_i32 = arith.constant 0 : i32
    %c0_i32_0 = arith.constant 0 : i32
    %c0_i32_1 = arith.constant 0 : i32
    return %arg0, %c0_i32, %c0_i32_0 : i32, i32, i32
  }
  func.func @transform_1(%arg0: i32) -> (i32, i32, i32) {
    %c0_i32 = arith.constant 0 : i32
    %c0_i32_0 = arith.constant 0 : i32
    %c0_i32_1 = arith.constant 0 : i32
    %c0_i32_2 = arith.constant 0 : i32
    return %c0_i32, %c0_i32_0, %c0_i32_1 : i32, i32, i32
  }
  func.func @transform_2(%arg0: i32) -> (i32, i32) {
    %c0_i32 = arith.constant 0 : i32
    %c0_i32_0 = arith.constant 0 : i32
    %c0_i32_1 = arith.constant 0 : i32
    return %c0_i32, %c0_i32_0 : i32, i32
  }
  func.func @transform_3(%arg0: i32) -> (i32, i32) {
    %c0_i32 = arith.constant 0 : i32
    %c0_i32_0 = arith.constant 0 : i32
    %c0_i32_1 = arith.constant 0 : i32
    return %c0_i32, %c0_i32_0 : i32, i32
  }
  func.func @transform_4(%arg0: i32) -> (i32, i32, i32) {
    %c0_i32 = arith.constant 0 : i32
    %c0_i32_0 = arith.constant 0 : i32
    %c0_i32_1 = arith.constant 0 : i32
    return %arg0, %c0_i32, %c0_i32_0 : i32, i32, i32
  }
}

</mosaic_0001>

<bundles_post_ra>
// kernel: lightnet_forward.1
= control target key start
LH: loop header
LB: loop body
LE: loop exit
PB: predicated region body
PF: predicated region fallthrough
CT: control target
= control target key end

     0   :  { %s704_s15 = smov 0   ;;  %s788_s0 = inlined_call_operand.vmem [shape: bf16[2,18,64], index: 0, kind: input, shape index: {}]   ;;  %s789_s1 = inlined_call_operand.vmem [shape: bf16[3,64,128], index: 1, kind: input, shape index: {}]   ;;  %s790_s2 = inlined_call_operand.vmem [shape: bf16[128,128], index: 2, kind: input, shape index: {}]   ;;  %s791_s3 = inlined_call_operand.vmem [shape: f32[2,128], index: 3, kind: input, shape index: {}]   ;;  %s792_s4 = inlined_call_operand.vmem [shape: f32[2,16,128], index: 4, kind: output, shape index: {}]  }
   0x1 LB: > { %s527_s16 = sadd.s32 4294967295, %s677_s15   ;;  %p531_p0 = scmp.ge.s32.totalorder %s677_s15, 1  ;;  %s677_s15 = sphi %s704_s15, %s14_s15  }
   0x2   : > { %p162_p1 = scmp.lt.s32.totalorder %s677_s15, 3 }
   0x4   : > { %p163_p2 = pnand %p531_p0, %p162_p1 }
   0x5   : > { %p188_p3 = scmp.lt.s32.totalorder (!%p163_p2), %s527_s16, 1 }
   0x6   : > { %166 = sbr.rel (%p163_p2) target bundleno = 323 (0x143), region = 36 }
   0xb   : > { %v649_v0 = vld [vmem:[%s789_s1 + $0x38] sm:$0xff]  ;;  %v648_v3 = vld [vmem:[%s789_s1 + $0x30] sm:$0xff]  ;;  %s794_s16 = smov (!%p188_p3, %s527_s16), 1  ;;  %v647_v7 = vld [vmem:[%s789_s1 + $0x28] sm:$0xff]  ;;  %vm332_vm0 = vcmask 1046528   ;;  %vm265_vm2 = vcmask 523264  }
   0xc   : > { %v645_v1 = vld [vmem:[%s789_s1 + $0x18] sm:$0xff]  ;;  %273 = vmatpush.bf16.msra.mxu0 %v649_v0  ;;  %v644_v4 = vld [vmem:[%s789_s1 + $0x10] sm:$0xff]  ;;  %s662_s29 = smul.u32 12, %s794_s16  ;;  %v643_v8 = vld [vmem:[%s789_s1 + $0x8] sm:$0xff]  ;;  %vm228_vm1 = vsmask.f32 7424 }
   0xd   : > { %v653_v2 = vld [vmem:[%s789_s1 + $0x58] sm:$0xff]  ;;  %313 = vmatpush.bf16.msra.mxu1 %v645_v1  ;;  %v652_v5 = vld [vmem:[%s789_s1 + $0x50] sm:$0xff]  ;;  %v651_v9 = vld [vmem:[%s789_s1 + $0x48] sm:$0xff]  ;;  %s640_s13 = sshll.u32 %s794_s16, 4 }
   0xe   : > { %367 = vmatpush.bf16.msra.mxu2 %v653_v2  ;;  %v661_v6 = vld [vmem:[%s790_s2 + $0x38] sm:$0xff]  ;;  %s192_s14 = scalar_lea.vmem %s788_s0, %s662_s29  ;;  %v660_v12 = vld [vmem:[%s790_s2 + $0x30] sm:$0xff]  ;;  %v646_v16 = vld [vmem:[%s789_s1 + $0x20] sm:$0xff]  ;;  %s197_s18 = scalar_lea.vmem %s792_s4, %s640_s13 }
   0xf   : > { %v641_v10 = vld [vmem:[%s192_s14] sm:$0xff]  ;;  %v201_v11 = vld [vmem:[%s192_s14 + $0x8] sm:$0x1]  ;;  %454 = vmatpush.bf16.msra.mxu3 %v661_v6  ;;  %v657_v30 = vld [vmem:[%s790_s2 + $0x18] sm:$0xff] }
  0x10   : > { %274 = vmatpush.bf16.msra.mxu0 %v648_v3  ;;  %v225_v13 = vunpack.c.l.b16 %v201_v11  ;;  %v230_v14 = vshrl.u32 %v641_v10, 16  ;;  %v232_v15 = vshll.u32 %v641_v10, 16  ;;  %v642_v17 = vld [vmem:[%s789_s1] sm:$0xff]  ;;  %v333_v21 = vrot.slane %v641_v10, 1  ;;  %v659_v28 = vld [vmem:[%s790_s2 + $0x28] sm:$0xff]  ;;  %v656_v31 = vld [vmem:[%s790_s2 + $0x10] sm:$0xff] }
  0x11   : > { %314 = vmatpush.bf16.msra.mxu1 %v644_v4  ;;  %v650_v19 = vld [vmem:[%s789_s1 + $0x40] sm:$0xff]  ;;  %v655_v32 = vld [vmem:[%s790_s2 + $0x8] sm:$0xff] }
  0x12   : > { %368 = vmatpush.bf16.msra.mxu2 %v652_v5  ;;  %v227_v18 = vpack.c.b16 %v225_v13, %v225_v13  ;;  %v234_v20 = vrot.slane %v232_v15, 1  ;;  %v658_v29 = vld [vmem:[%s790_s2 + $0x20] sm:$0xff] }
  0x13   : > { %455 = vmatpush.bf16.msra.mxu3 %v660_v12  ;;  %v654_v33 = vld [vmem:[%s790_s2] sm:$0xff] }
  0x14   : > { %275 = vmatpush.bf16.msra.mxu0 %v647_v7  ;;  %v237_v22 = vshll.u32 %v227_v18, 16  ;;  %v334_v23 = vrot.slane %v227_v18, 1  ;;  %v235_v24 = vor.u32 %v234_v20, %v230_v14  ;;  %v202_v37 = vld [vmem:[%s791_s3] sm:$0x3] }
  0x15   : > { %315 = vmatpush.bf16.msra.mxu1 %v643_v8  ;;  %v379_v40 = vperm.slane %v202_v37, 0  ;;  %v405_v53 = vperm.slane %v202_v37, 1 }
  0x16   : > { %369 = vmatpush.bf16.msra.mxu2 %v651_v9  ;;  %v239_v25 = vrot.slane %v237_v22, 1  ;;  %v335_v26 = vsel %vm332_vm0, %v333_v21, %v334_v23 }
  0x17   : > { %456 = vmatpush.bf16.msra.mxu3 %v659_v28 }
  0x18   : > { %276 = vmatpush.bf16.msra.mxu0 %v646_v16  ;;  %v240_v27 = vsel %vm228_vm1, %v235_v24, %v239_v25 }
  0x19   : > { %316 = vmatpush.bf16.msra.mxu1 %v642_v17 }
  0x1a   : > { %370 = vmatpush.bf16.msra.mxu2 %v650_v19 }
  0x1b   : > { %563 = vmatmul.msk.bf16.vlgmr.msra.gmra.mxu0 %vm265_vm2, %v240_v27  ;;  %457 = vmatpush.bf16.msra.mxu3 %v658_v29 }
  0x1c   : > { %580 = vmatmul.msk.bf16.vlgmr.msra.gmra.mxu1 %vm265_vm2, %v641_v10 }
  0x1d   : > { %605 = vmatmul.msk.bf16.vlgmr.msra.gmra.mxu2 %vm265_vm2, %v335_v26 }
  0x1f   : > { %458 = vmatpush.bf16.msra.mxu3 %v657_v30 }
  0x23   : > { %459 = vmatpush.bf16.msra.mxu3 %v656_v31 }
  0x27   : > { %460 = vmatpush.bf16.msra.mxu3 %v655_v32 }
  0x2b   : > { %461 = vmatpush.bf16.msra.mxu3 %v654_v33 }
  0x98   : > { %v278_v34 = vpop.f32.mrf.mxu0 }
  0x99   : > { %v318_v35 = vpop.f32.mrf.mxu1 }
  0x9a   : > { %v319_v36 = vadd.f32 %v318_v35, %v278_v34 }
  0xa0   : > { %v372_v38 = vpop.f32.mrf.mxu2  ;;  %v280_v41 = vpop.f32.mrf.mxu0 }
  0xa1   : > { %v377_v39 = vadd.f32 %v372_v38, %v319_v36  ;;  %v320_v42 = vpop.f32.mrf.mxu1 }
  0xa2   : > { %v321_v44 = vadd.f32 %v320_v42, %v280_v41 }
  0xa3   : > { %v380_v43 = vadd.f32 %v379_v40, %v377_v39 }
  0xa5   : > { %v384_v48 = vmul.f32 0.1, %v380_v43  ;;  %vm382_vm3 = vcmp.gt.f32.partialorder %v380_v43, 0.0 }
  0xa7   : > { %v386_v50 = vsel %vm382_vm3, %v380_v43, %v384_v48 }
  0xa8   : > { %v374_v45 = vpop.f32.mrf.mxu2 }
  0xa9   : > { %v378_v46 = vadd.f32 %v374_v45, %v321_v44 }
  0xab   : > { %v381_v47 = vadd.f32 %v379_v40, %v378_v46 }
  0xad   : > { %vm383_vm4 = vcmp.gt.f32.partialorder %v381_v47, 0.0  ;;  %v385_v49 = vmul.f32 0.1, %v381_v47 }
  0xaf   : > { %v387_v51 = vsel %vm383_vm4, %v381_v47, %v385_v49 }
  0xb0   : > { %v388_v52 = vpack.c.bf16 %v387_v51, %v386_v50 }
  0xb2   : > { %462 = vmatmul.bf16.vlgmr.msra.gmra.mxu3 %v388_v52 }
 0x135   : > { %v463_v54 = vpop.f32.mrf.mxu3 }
 0x136   : > { %v464_v55 = vadd.f32 %v463_v54, %v405_v53 }
 0x138   : > { %v468_v56 = vmax.f32 %v464_v55, 0.0 }
 0x13a   : > { %470 = vst [vmem:[%s197_s18] sm:$0xff] %v468_v56 }
 0x13d   : > { %v465_v57 = vpop.f32.mrf.mxu3 }
 0x13e   : > { %v466_v58 = vadd.f32 %v465_v57, %v405_v53 }
 0x140   : > { %v469_v59 = vmax.f32 %v466_v58, 0.0 }
 0x142   : > { %471 = vst [vmem:[%s197_s18 + $0x8] sm:$0xff] %v469_v59 }
 0x143 PF: > { %s14_s15 = sadd.s32 1, %s677_s15  }
 0x144   : > { %p11_p4 = scmp.ge.s32.totalorder %s14_s15, 4  }
 0x146   :  { %13 = sbr.rel (!%p11_p4) target bundleno = 1 (0x1), region = 68 }

</bundles_post_ra>
